<compile_context>
chip_gen: v6e
topology: v6e:2x2x1
jax: 0.10.0
libtpu: 0.0.40
codegen_flags: <defaults>
</compile_context>

<pallas_src>
import functools

import jax
import jax.numpy as jnp
from jax import lax
from jax.experimental import pallas as pl
from jax.experimental.pallas import tpu as pltpu


def _round_up(x, m):
    return (x + m - 1) // m * m


def _cdiv(a, b):
    return (a + b - 1) // b


# --------------------------------------------------------------------------
# One-time per-prompt setup: v[b, c, d] = sum_e labels[b, c, e] * W[d, e]
# --------------------------------------------------------------------------
def _label_proj_kernel(lbl_ref, w_ref, v_ref):
    # lbl_ref: (Cp, Dp) bf16, w_ref: (Dp, Dp) bf16, v_ref: (Cp, Dp) bf16
    v = lax.dot_general(
        lbl_ref[...], w_ref[...],
        dimension_numbers=(((1,), (1,)), ((), ())),   # contract over e
        preferred_element_type=jnp.float32,
    )                                                 # (Cp, Dp) f32
    v_ref[...] = v.astype(jnp.bfloat16)


@jax.jit
def prepare_label_projection(labels, w_proj):
    """labels: [B, C, D], w_proj: [D, D] -> v: [B, Cp, Dp] bf16 (padded).

    Call once per prompt / label set; reuse across scoring calls.
    """
    B, C, D = labels.shape
    Dp = _round_up(D, 128)
    Cp = _round_up(max(C, 128), 128)

    lbl = jnp.zeros((B, Cp, Dp), jnp.bfloat16).at[:, :C, :D].set(
        labels.astype(jnp.bfloat16))
    w = jnp.zeros((Dp, Dp), jnp.bfloat16).at[:D, :D].set(
        w_proj.astype(jnp.bfloat16))

    grid_spec = pltpu.PrefetchScalarGridSpec(
        num_scalar_prefetch=0,
        grid=(B,),
        in_specs=[
            pl.BlockSpec((None, Cp, Dp), lambda b: (b, 0, 0)),   # labels
            pl.BlockSpec((Dp, Dp), lambda b: (0, 0)),            # W
        ],
        out_specs=pl.BlockSpec((None, Cp, Dp), lambda b: (b, 0, 0)),
    )

    return pl.pallas_call(
        _label_proj_kernel,
        out_shape=jax.ShapeDtypeStruct((B, Cp, Dp), jnp.bfloat16),
        grid_spec=grid_spec,
        compiler_params=pltpu.CompilerParams(
            dimension_semantics=("parallel",)),
    )(lbl, w)


# --------------------------------------------------------------------------
# Per-call hot path: scores[b, l, c] = sigmoid( sum_d tokens[b,l,d] * v[b,c,d] )
# --------------------------------------------------------------------------
def _score_kernel(tok_ref, v_ref, o_ref):
    # tok_ref: (TL, Dp) tokens (f32/bf16) — cast to bf16 in-kernel (no
    #          extra HBM pre-pass over the token stream).
    # v_ref:   (Cp, Dp) bf16 projected labels (= labels @ W^T)
    # o_ref:   (TL, Cp)
    tok = tok_ref[...].astype(jnp.bfloat16)
    scores = lax.dot_general(
        tok, v_ref[...],
        dimension_numbers=(((1,), (1,)), ((), ())),   # contract over d
        preferred_element_type=jnp.float32,
    )                                                 # (TL, Cp) f32
    o_ref[...] = jax.nn.sigmoid(scores).astype(o_ref.dtype)


def _choose_token_tile(L, B, tl):
    TL = min(tl, _round_up(L, 8))
    # v7x has 2 TensorCores; a "parallel" grid axis only shards if there are
    # multiple steps.  Keep >= 4 total grid steps (also helps DMA pipelining)
    # without shrinking tiles below 256 rows (mem-bound efficiency).
    while B * _cdiv(L, TL) < 4 and TL > 256:
        TL = max(256, _round_up(_cdiv(TL, 2), 8))
    return TL


@functools.partial(jax.jit, static_argnames=("num_labels", "tl", "out_dtype"))
def score_tokens(tokens, v_proj, num_labels, *, tl=512, out_dtype=jnp.float32):
    """tokens: [B, L, D]; v_proj: [B, Cp, Dp] bf16 from prepare_label_projection.

    Returns scores: [B, L, num_labels] = sigmoid((tokens @ W) @ labels^T).
    """
    B, L, D = tokens.shape
    _, Cp, Dp = v_proj.shape

    TL = _choose_token_tile(L, B, tl)
    Lp = _round_up(L, TL)
    n_l = Lp // TL

    # Common case (D already lane-aligned, L divisible by TL): feed tokens
    # straight through — the f32 -> bf16 cast happens inside the kernel, so
    # there is no extra read+write pass over the token stream in HBM.
    if (Dp == D) and (Lp == L):
        tok_in = tokens
    else:
        tok_in = jnp.zeros((B, Lp, Dp), tokens.dtype).at[:, :L, :D].set(tokens)

    grid_spec = pltpu.PrefetchScalarGridSpec(
        num_scalar_prefetch=0,
        grid=(B, n_l),
        in_specs=[
            pl.BlockSpec((None, TL, Dp), lambda b, l: (b, l, 0)),   # tokens
            pl.BlockSpec((None, Cp, Dp), lambda b, l: (b, 0, 0)),   # v (labels@W^T)
        ],
        out_specs=pl.BlockSpec((None, TL, Cp), lambda b, l: (b, l, 0)),
    )

    tok_itemsize = jnp.dtype(tok_in.dtype).itemsize
    out_itemsize = jnp.dtype(out_dtype).itemsize
    # Exact double-buffered footprint (no extra 2x), + headroom for Mosaic
    # internal scratch; cap at 48 MiB so v7x (64 MiB physical) keeps slack.
    vmem_needed = (2 * TL * Dp * tok_itemsize     # token tiles
                   + 2 * Cp * Dp * 2              # v tiles (bf16)
                   + 2 * TL * Cp * out_itemsize)  # output tiles
    vmem_limit = int(min(48 << 20, max(32 << 20, vmem_needed + (4 << 20))))

    cost = pl.CostEstimate(
        flops=2 * B * Lp * Dp * Cp,
        transcendentals=B * Lp * Cp,
        bytes_accessed=(B * Lp * Dp * tok_itemsize
                        + B * Cp * Dp * 2
                        + B * Lp * Cp * out_itemsize),
    )

    out = pl.pallas_call(
        _score_kernel,
        out_shape=jax.ShapeDtypeStruct((B, Lp, Cp), out_dtype),
        grid_spec=grid_spec,
        compiler_params=pltpu.CompilerParams(
            dimension_semantics=("parallel", "parallel"),
            vmem_limit_bytes=vmem_limit,
        ),
        cost_estimate=cost,
    )(tok_in, v_proj)

    return out[:, :L, :num_labels]


def instruct_score(tokens, labels, w_proj, *, tl=512, out_dtype=jnp.float32):
    """Convenience wrapper: full scoring in one call.

    In real GLiNER usage call prepare_label_projection() once per prompt and
    reuse its result across many score_tokens() calls.
    """
    v = prepare_label_projection(labels, w_proj)
    return score_tokens(tokens, v, labels.shape[1], tl=tl, out_dtype=out_dtype)


def instruct_score_ref(tokens, labels, w_proj):
    h = jnp.einsum("bld,de->ble", tokens, w_proj)
    s = jnp.einsum("ble,bce->blc", h, labels)
    return jax.nn.sigmoid(s)


if __name__ == "__main__":
    B, L, C, D = 2, 128, 8, 128   # batch, seq len, entity types, hidden

    key = jax.random.PRNGKey(0)
    k_tok, k_lbl, k_w = jax.random.split(key, 3)

    tokens = jax.random.normal(k_tok, (B, L, D), dtype=jnp.float32)
    # Deterministic synthetic parameter / embedding init (no checkpoint load).
    labels = (jax.random.normal(k_lbl, (B, C, D), dtype=jnp.float32)
              / jnp.sqrt(jnp.float32(D)))
    w_proj = (jax.random.normal(k_w, (D, D), dtype=jnp.float32)
              / jnp.sqrt(jnp.float32(D)))

    # One-time label/prompt setup, then the per-call hot path.
    v = prepare_label_projection(labels, w_proj)
    v = jax.block_until_ready(v)
    out = score_tokens(tokens, v, C)
    out = jax.block_until_ready(out)

    ref = instruct_score_ref(tokens, labels, w_proj)
    assert out.shape == (B, L, C)
    # bf16 MXU operands (f32 accumulation) vs the pure-f32 reference.
    assert jnp.allclose(out, ref, atol=2e-2, rtol=0.0), (
        float(jnp.max(jnp.abs(out - ref))))

    print("KERNEL_OK")
</pallas_src>

<mosaic_0001>
module attributes {stable_mosaic.version = 11 : i64} {
  func.func @_label_proj_kernel(%arg0: i32, %arg1: memref<1x128x128xbf16, #tpu.memory_space<vmem>>, %arg2: memref<128x128xbf16, #tpu.memory_space<vmem>>, %arg3: memref<1x128x128xbf16, #tpu.memory_space<vmem>>) attributes {dimension_semantics = [#tpu.dimension_semantics<parallel>], iteration_bounds = array<i64: 2>, scalar_prefetch = 0 : i64, scratch_operands = 0 : i64, tpu.core_type = #tpu.core_type<tc>, window_params = [{transform_indices = @transform_0, window_bounds = array<i64: 1, 128, 128>}, {pipeline_mode = #tpu.pipeline_mode<synchronous>, transform_indices = @transform_1, window_bounds = array<i64: 128, 128>}, {transform_indices = @transform_2, window_bounds = array<i64: 1, 128, 128>}]} {
    %c0 = arith.constant 0 : index
    %c0_0 = arith.constant 0 : index
    %c0_1 = arith.constant 0 : index
    %0 = vector.load %arg1[%c0, %c0_0, %c0_1] : memref<1x128x128xbf16, #tpu.memory_space<vmem>>, vector<1x128x128xbf16>
    %1 = vector.shape_cast %0 : vector<1x128x128xbf16> to vector<128x128xbf16>
    %c0_2 = arith.constant 0 : index
    %c0_3 = arith.constant 0 : index
    %2 = vector.load %arg2[%c0_2, %c0_3] : memref<128x128xbf16, #tpu.memory_space<vmem>>, vector<128x128xbf16>
    %cst = arith.constant dense<0.000000e+00> : vector<128x128xf32>
    %3 = tpu.matmul %1, %2, %cst {dimension_numbers = #tpu.dot_dimension_numbers<[1], [1], [0], [0], [0, 0, 1, 0], [], []>} : vector<128x128xbf16>, vector<128x128xbf16>, vector<128x128xf32> -> vector<128x128xf32>
    %4 = arith.truncf %3 : vector<128x128xf32> to vector<128x128xbf16>
    %c0_4 = arith.constant 0 : index
    %c0_5 = arith.constant 0 : index
    %c0_6 = arith.constant 0 : index
    %5 = vector.load %arg3[%c0_4, %c0_5, %c0_6] : memref<1x128x128xbf16, #tpu.memory_space<vmem>>, vector<1x128x128xbf16>
    %6 = vector.shape_cast %5 : vector<1x128x128xbf16> to vector<128x128xbf16>
    %7 = vector.shape_cast %4 : vector<128x128xbf16> to vector<1x128x128xbf16>
    tpu.vector_store %arg3[%c0_4, %c0_5, %c0_6], %7 {strides = array<i32>} : memref<1x128x128xbf16, #tpu.memory_space<vmem>>, vector<1x128x128xbf16>,
    return
  }
  func.func @transform_0(%arg0: i32) -> (i32, i32, i32) {
    %c0_i32 = arith.constant 0 : i32
    %c0_i32_0 = arith.constant 0 : i32
    %c0_i32_1 = arith.constant 0 : i32
    return %arg0, %c0_i32, %c0_i32_0 : i32, i32, i32
  }
  func.func @transform_1(%arg0: i32) -> (i32, i32) {
    %c0_i32 = arith.constant 0 : i32
    %c0_i32_0 = arith.constant 0 : i32
    %c0_i32_1 = arith.constant 0 : i32
    return %c0_i32, %c0_i32_0 : i32, i32
  }
  func.func @transform_2(%arg0: i32) -> (i32, i32, i32) {
    %c0_i32 = arith.constant 0 : i32
    %c0_i32_0 = arith.constant 0 : i32
    %c0_i32_1 = arith.constant 0 : i32
    return %arg0, %c0_i32, %c0_i32_0 : i32, i32, i32
  }
}

</mosaic_0001>

<bundles_post_ra>
// kernel: prepare_label_projection.1
= control target key start
LH: loop header
LB: loop body
LE: loop exit
PB: predicated region body
PF: predicated region fallthrough
CT: control target
= control target key end

     0   :  { %7 = vsyncpa [#allocation3], 0  ;;  %s974_s0 = inlined_call_operand.vmem [shape: bf16[2,128,128], index: 0, kind: input, shape index: {}]   ;;  %s975_s1 = inlined_call_operand.vmem [shape: bf16[128,128], index: 1, kind: input, shape index: {}]   ;;  %s976_s2 = inlined_call_operand.hbm [shape: bf16[2,128,128], index: 2, kind: output, shape index: {}]  }
   0x1   :  { %9 = vsyncpa [#allocation3 + $0x1], 0  ;;  %s834_s9 = smov 0   ;;  %s836_s10 = smov 0  }
   0x2   :  { %s838_s11 = smov 0   ;;  %s840_s12 = smov 0  }
   0x3 LB: > { %s855_s13 = sadd.s32 4294967295, %s814_s12   ;;  %s524_s14 = sadd.s32 4294967294, %s814_s12   ;;  %s814_s12 = sphi %s840_s12, %s982_s12   ;;  %s810_s11 = sphi %s838_s11, %s981_s11   ;;  %s806_s10 = sphi %s836_s10, %s980_s10   ;;  %s802_s9 = sphi %s834_s9, %s979_s9  }
   0x4   : > { %s859_s15 = sadd.s32 1, %s814_s12   ;;  %s69_s16 = sadd.s32 1, %s810_s11 }
   0x5   : > { %s66_s17 = ssub.s32 %s814_s12, %s859_s15  ;;  %p79_p0 = scmp.ne.s32.totalorder %s810_s11, %s806_s10 }
   0x6   : > { %p67_p1 = scmp.eq.s32.totalorder %s66_s17, 0  ;;  %p80_p2 = scmp.eq.s32.totalorder %s855_s13, 1 }
   0x7   : > { %p85_p3 = scmp.ne.s32.totalorder %s806_s10, %s802_s9  ;;  %p86_p4 = scmp.eq.s32.totalorder %s524_s14, 1 }
   0x8   : > { %s870_s18 = scalar_select %p67_p1, %s810_s11, %s69_s16  }
   0x9   : > { %p872_p5 = por %p80_p2, %p79_p0  ;;  %p876_p6 = por %p86_p4, %p85_p3 }
   0xa   : > { %p527_p7 = scmp.ge.s32.totalorder %s814_s12, 1  ;;  %p115_p8 = scmp.lt.s32.totalorder %s814_s12, 3 }
   0xc   : > { %p116_p9 = pnand %p527_p7, %p115_p8 }
   0xd   : > { %p137_p10 = scmp.lt.s32.totalorder (!%p116_p9), %s855_s13, 1  ;;  %s134_s23 = sand.u32 (!%p116_p9), 1, %s806_s10  }
   0xe   : > { %119 = sbr.rel (%p116_p9) target bundleno = 307 (0x133), region = 28  ;;  %s528_s24 = sshll.u32 (!%p116_p9), %s134_s23, 6 }
   0xf   : > { %s816_s4 = smov (!%p116_p9), [#allocation2]  }
  0x10   : > { %s758_s5 = sshll.u32 (!%p116_p9), %s816_s4, 4  ;;  %s759_s5 = int_to_ptr.vmem [resolvable:$false] %s758_s5 }
  0x11   : > { %s760_s6 = scalar_lea.vmem (!%p116_p9), %s759_s5, 2048 }
  0x13   : > { %v738_v0 = vld [vmem:[%s975_s1 + $0x38] sm:$0xff]   ;;  %v739_v1 = vld [vmem:[%s975_s1 + $0x30] sm:$0xff]   ;;  %s138_s25 = scalar_select %p137_p10, %s855_s13, 1  ;;  %v740_v2 = vld [vmem:[%s975_s1 + $0x28] sm:$0xff]  }
  0x14   : > { %649 = vmatprep.subr.bf16.mxu0 %v738_v0  ;;  %681 = vmatprep.subr.bf16.mxu1 %v738_v0  ;;  %v741_v5 = vld [vmem:[%s975_s1 + $0x20] sm:$0xff]   ;;  %v742_v6 = vld [vmem:[%s975_s1 + $0x18] sm:$0xff]   ;;  %v743_v7 = vld [vmem:[%s975_s1 + $0x10] sm:$0xff]  }
  0x15   : > { %650 = vmatpush3.bf16.xpose.msra.mxu0 %v738_v0  ;;  %689 = vmatpush3.bf16.xpose.msra.mxu1 %v738_v0  ;;  %s568_s26 = sshll.u32 %s138_s25, 6  ;;  %v744_v8 = vld [vmem:[%s975_s1 + $0x8] sm:$0xff]   ;;  %v745_v9 = vld [vmem:[%s975_s1] sm:$0xff]   ;;  %s136_s25 = scalar_lea.vmem [#allocation2], %s528_s24 }
  0x16   : > { %651 = vmatprep.subr.bf16.mxu0 %v739_v1  ;;  %682 = vmatprep.subr.bf16.mxu1 %v739_v1  ;;  %s893_s29 = scalar_lea.vmem %s974_s0, %s568_s26  ;;  %s585_s26 = sshll.u32 %s855_s13, 10 }
  0x17   : > { %v746_v3 = vld [vmem:[%s893_s29] sm:$0xff]   ;;  %v748_v10 = vld [vmem:[%s893_s29 + $0x8] sm:$0xff]   ;;  %v750_v12 = vld [vmem:[%s893_s29 + $0x10] sm:$0xff]   ;;  %s462_s27 = sshll.u32 %s136_s25, 4  ;;  %s928_s30 = scalar_lea.hbm %s976_s2, %s585_s26  ;;  %s930_s27 = int_to_ptr.vmem [resolvable:$true] %s462_s27 }
  0x18   : > { %v747_v4 = vld [vmem:[%s893_s29 + $0x20] sm:$0xff]   ;;  %665 = vmatprep.mubr.bf16.mxu0 %v746_v3  ;;  %v749_v11 = vld [vmem:[%s893_s29 + $0x28] sm:$0xff]   ;;  %v751_v13 = vld [vmem:[%s893_s29 + $0x30] sm:$0xff]   ;;  %s934_s13 = scalar_lea.sflag [#allocation3], %s134_s23  ;;  %s754_s3 = scalar_lea.vmem %s930_s27, 1024 }
  0x19   : > { %673 = vmatprep.mubr.bf16.mxu1 %v747_v4  ;;  %v752_v14 = vld [vmem:[%s893_s29 + $0x18] sm:$0xff]   ;;  %p755_p11 = scmp.ne.s32.totalorder %s930_s27, %s754_s3  ;;  %p761_p0 = scmp.lt.s32.totalorder %s930_s27, %s759_s5 }
  0x1a   : > { %v753_v15 = vld [vmem:[%s893_s29 + $0x38] sm:$0xff]   ;;  %p762_p1 = scmp.lt.s32.totalorder %s760_s6, %s754_s3 }
  0x1b   : > { %p756_p12 = pnand %p755_p11, %p872_p5 }
  0x1c   : > { %p763_p2 = por %p762_p1, %p761_p0 }
  0x1d   : > { %652 = vmatpush3.bf16.xpose.msra.mxu0 %v739_v1  ;;  %690 = vmatpush3.bf16.xpose.msra.mxu1 %v739_v1  ;;  %p757_p13 = pneg %p756_p12 }
  0x1e   : > { %653 = vmatprep.subr.bf16.mxu0 %v740_v2  ;;  %683 = vmatprep.subr.bf16.mxu1 %v740_v2 }
  0x1f   : > { %p764_p3 = pnand %p763_p2, %p757_p13 }
  0x25   : > { %654 = vmatpush3.bf16.xpose.msra.mxu0 %v740_v2  ;;  %691 = vmatpush3.bf16.xpose.msra.mxu1 %v740_v2 }
  0x26   : > { %655 = vmatprep.subr.bf16.mxu0 %v741_v5  ;;  %684 = vmatprep.subr.bf16.mxu1 %v741_v5 }
  0x2d   : > { %656 = vmatpush3.bf16.xpose.msra.mxu0 %v741_v5  ;;  %692 = vmatpush3.bf16.xpose.msra.mxu1 %v741_v5 }
  0x2e   : > { %657 = vmatprep.subr.bf16.mxu0 %v742_v6  ;;  %685 = vmatprep.subr.bf16.mxu1 %v742_v6 }
  0x35   : > { %658 = vmatpush3.bf16.xpose.msra.mxu0 %v742_v6  ;;  %693 = vmatpush3.bf16.xpose.msra.mxu1 %v742_v6 }
  0x36   : > { %659 = vmatprep.subr.bf16.mxu0 %v743_v7  ;;  %686 = vmatprep.subr.bf16.mxu1 %v743_v7 }
  0x3d   : > { %660 = vmatpush3.bf16.xpose.msra.mxu0 %v743_v7  ;;  %694 = vmatpush3.bf16.xpose.msra.mxu1 %v743_v7 }
  0x3e   : > { %661 = vmatprep.subr.bf16.mxu0 %v744_v8  ;;  %687 = vmatprep.subr.bf16.mxu1 %v744_v8 }
  0x45   : > { %662 = vmatpush3.bf16.xpose.msra.mxu0 %v744_v8  ;;  %695 = vmatpush3.bf16.xpose.msra.mxu1 %v744_v8 }
  0x46   : > { %663 = vmatprep.subr.bf16.mxu0 %v745_v9  ;;  %688 = vmatprep.subr.bf16.mxu1 %v745_v9 }
  0x4d   : > { %664 = vmatpush3.bf16.xpose.msra.mxu0 %v745_v9  ;;  %696 = vmatpush3.bf16.xpose.msra.mxu1 %v745_v9 }
  0x54   : > { %666 = vmatmul.mubr.bf16.vlgmr.msra.gmra.mxu0 %v748_v10  ;;  %674 = vmatmul.mubr.bf16.vlgmr.msra.gmra.mxu1 %v749_v11 }
  0x55   : > { %669 = vmatprep.mubr.bf16.mxu0 %v750_v12  ;;  %677 = vmatprep.mubr.bf16.mxu1 %v751_v13 }
  0x5c   : > { %670 = vmatmul.mubr.bf16.gmra.mxu0 %v752_v14  ;;  %678 = vmatmul.mubr.bf16.gmra.mxu1 %v753_v15 }
 0x114   : > { %v667_v16 = vpop.f32.mrf.mxu0  ;;  %v675_v17 = vpop.f32.mrf.mxu1 }
 0x116   : > { %v305_v18 = vpop.f32.mrf.mxu0  ;;  %v337_v19 = vpop.f32.mrf.mxu1 }
 0x118   : > { %v668_v20 = vpop.f32.mrf.mxu0  ;;  %v676_v21 = vpop.f32.mrf.mxu1 }
 0x119   : > { %v594_v22 = vpack.c.bf16 %v668_v20, %v667_v16  ;;  %v614_v23 = vpack.c.bf16 %v676_v21, %v675_v17 }
 0x11a   : > { %v308_v24 = vpop.f32.mrf.mxu0  ;;  %v340_v25 = vpop.f32.mrf.mxu1 }
 0x11b   : > { %626 = vst [vmem:[%s136_s25 + $0x8] sm:$0xff] %v594_v22   ;;  %630 = vst [vmem:[%s136_s25 + $0x28] sm:$0xff] %v614_v23   ;;  %v589_v26 = vpack.c.bf16 %v308_v24, %v305_v18  ;;  %v609_v27 = vpack.c.bf16 %v340_v25, %v337_v19 }
 0x11c   : > { %v671_v28 = vpop.f32.mrf.mxu0  ;;  %v679_v29 = vpop.f32.mrf.mxu1 }
 0x11d   : > { %590 = vst [vmem:[%s136_s25] sm:$0xff] %v589_v26   ;;  %629 = vst [vmem:[%s136_s25 + $0x20] sm:$0xff] %v609_v27  }
 0x11e   : > { %v321_v30 = vpop.f32.mrf.mxu0  ;;  %v353_v31 = vpop.f32.mrf.mxu1 }
 0x120   : > { %v672_v32 = vpop.f32.mrf.mxu0  ;;  %v680_v33 = vpop.f32.mrf.mxu1 }
 0x121   : > { %v604_v34 = vpack.c.bf16 %v672_v32, %v671_v28  ;;  %v624_v35 = vpack.c.bf16 %v680_v33, %v679_v29 }
 0x122   : > { %v324_v36 = vpop.f32.mrf.mxu0  ;;  %v356_v37 = vpop.f32.mrf.mxu1 }
 0x123   : > { %628 = vst [vmem:[%s136_s25 + $0x18] sm:$0xff] %v604_v34   ;;  %632 = vst [vmem:[%s136_s25 + $0x38] sm:$0xff] %v624_v35   ;;  %v599_v38 = vpack.c.bf16 %v324_v36, %v321_v30  ;;  %v619_v39 = vpack.c.bf16 %v356_v37, %v353_v31 }
 0x125   : > { %627 = vst [vmem:[%s136_s25 + $0x10] sm:$0xff] %v599_v38   ;;  %631 = vst [vmem:[%s136_s25 + $0x30] sm:$0xff] %v619_v39  }
 0x126   : > { %767 = shalt.err (!%p764_p3)
}
 0x127   : > { %s768_s7 = scalar_lea.hbm %s928_s30, 1024  ;;  %s772_s16 = scalar_lea.hbm %s976_s2, 2048 }
 0x128   : > { %p769_p4 = scmp.ne.s32.totalorder %s928_s30, %s768_s7  ;;  %p773_p9 = scmp.lt.s32.totalorder %s928_s30, %s976_s2 }
 0x129   : > { %p774_p10 = scmp.lt.s32.totalorder %s772_s16, %s768_s7 }
 0x12a   : > { %p770_p7 = pnand %p769_p4, %p872_p5 }
 0x12b   : > { %p775_p11 = por %p774_p10, %p773_p9 }
 0x12c   : > { %p771_p8 = pneg %p770_p7 }
 0x12e   : > { %p776_p12 = pnand %p775_p11, %p771_p8 }
 0x130   : > { %779 = shalt.err (!%p776_p12)
}
 0x131   : > { %s817_s22 = smov 64   ;;  %s818_s23 = smov 4  }
 0x132   : > { %697 = dma.vmem_to_hbm [thread:$0]  (%p872_p5), %s930_s27, 1024, %s928_s30, %s934_s13, %s817_s22, %s817_s22, %s818_s23  }
 0x133 PF: > { %p703_p13 = scmp.ge.s32.totalorder %s814_s12, 2  ;;  %s477_s24 = sand.u32 1, %s802_s9  }
 0x134   : > { %s478_s25 = scalar_lea.sflag [#allocation3], %s477_s24 }
 0x135   : > { %p700_p0 = pnand %p703_p13, %p876_p6 }
 0x137   : > { %p701_p1 = pneg %p700_p0 }
 0x139   : > { %797 = dma.done.wait (%p701_p1), %s478_s25, 1024  }
 0x13a   : > { %799 = vsyncadd (%p701_p1), %s478_s25, 4294966272  ;;  %p12_p2 = scmp.ge.s32.totalorder %s859_s15, 4   ;;  %s979_s9 = smov %s806_s10 }
 0x13b   : > { %s980_s10 = smov %s810_s11  ;;  %s981_s11 = smov %s870_s18 }
 0x13c   : > { %s982_s12 = smov %s859_s15  ;;  %14 = sbr.rel (!%p12_p2) target bundleno = 3 (0x3), region = 63 }
 0x141   :  { %483 = vsyncpa [#allocation3], 1 }
 0x142   :  { %485 = vsyncpa [#allocation3 + $0x1], 1 }

</bundles_post_ra>
